<compile_context>
chip_gen: v7x
topology: tpu7x:2x2x1
jax: 0.10.0
libtpu: 0.0.40
codegen_flags: <defaults>
</compile_context>

<pallas_src>
import jax
import jax.numpy as jnp
from jax.experimental import pallas as pl
from jax.experimental.pallas import tpu as pltpu

TRIM_H = 28
TRIM_W = 28

# Per-step VMEM budget for the (double-buffered) input + output blocks.
_VMEM_BLOCK_BUDGET = 24 * 1024 * 1024   # 24 MiB of blocks
_VMEM_LIMIT_BYTES = 32 * 1024 * 1024    # scoped VMEM limit (OK on v5e/v6e/v7x)


def _round_up(x, m):
    return ((x + m - 1) // m) * m


def _trim_kernel(x_ref, o_ref):
    # x_ref: (TILE_P, H, W)          VMEM tile covering TILE_P (n, c) planes
    # o_ref: (TILE_P, 28, 28)        VMEM tile
    # Static slice of the leading 28x28 window of every plane in the block.
    o_ref[...] = x_ref[:, :TRIM_H, :TRIM_W]


def trim(x):
    """x: (N, C, H, W) with H >= 28, W >= 28. Returns x[:, :, :28, :28]."""
    assert x.ndim == 4, "Trim expects an NCHW tensor"
    N, C, H, W = x.shape
    assert H >= TRIM_H and W >= TRIM_W, "Trim expects spatial dims >= 28"

    P = N * C
    itemsize = jnp.dtype(x.dtype).itemsize

    # VMEM layout padding: lane dim -> multiple of 128, sublane dim ->
    # multiple of 8 * (32 bits / element bits)  (8 for f32, 16 bf16, 32 int8).
    sub_mult = 8 * max(1, 4 // itemsize)
    in_plane_vmem = _round_up(H, sub_mult) * _round_up(W, 128) * itemsize
    out_plane_vmem = _round_up(TRIM_H, sub_mult) * _round_up(TRIM_W, 128) * itemsize

    # 2x for BlockSpec double-buffering of each array.
    tile_p = _VMEM_BLOCK_BUDGET // (2 * (in_plane_vmem + out_plane_vmem))
    tile_p = max(1, min(tile_p, P))

    # Flatten contiguous leading (N, C) dims — free reshape — so each grid
    # step moves many planes instead of one.
    x_flat = x.reshape(P, H, W)

    grid = (pl.cdiv(P, tile_p),)

    # Pure memory movement: read the full planes, write the trimmed planes.
    cost = pl.CostEstimate(
        flops=0,
        transcendentals=0,
        bytes_accessed=P * (H * W + TRIM_H * TRIM_W) * itemsize,
    )

    out_flat = pl.pallas_call(
        _trim_kernel,
        out_shape=jax.ShapeDtypeStruct((P, TRIM_H, TRIM_W), x.dtype),
        grid_spec=pltpu.PrefetchScalarGridSpec(
            num_scalar_prefetch=0,
            grid=grid,
            in_specs=[
                # Last two block dims equal the full array dims -> satisfies
                # the (8, 128) tiling rule regardless of H, W values.
                pl.BlockSpec((tile_p, H, W), lambda p: (p, 0, 0)),
            ],
            out_specs=pl.BlockSpec(
                (tile_p, TRIM_H, TRIM_W), lambda p: (p, 0, 0)
            ),
        ),
        compiler_params=pltpu.CompilerParams(
            dimension_semantics=("parallel",),
            vmem_limit_bytes=_VMEM_LIMIT_BYTES,
        ),
        cost_estimate=cost,
    )(x_flat)

    return out_flat.reshape(N, C, TRIM_H, TRIM_W)


if __name__ == "__main__":
    key = jax.random.PRNGKey(0)
    # Small NCHW input with spatial dims >= 28 (as the module requires):
    # batch=2, channels=4, 32x32 spatial (e.g. a ConvTranspose output).
    x = jax.random.normal(key, (2, 4, 32, 32), dtype=jnp.float32)

    y = trim(x)
    y = jax.block_until_ready(y)

    # Correctness check against the pure-JAX reference (same slice semantics
    # as the PyTorch module).
    ref = x[:, :, :28, :28]
    assert y.shape == (2, 4, 28, 28)
    assert y.dtype == x.dtype
    assert jnp.array_equal(y, ref)

    print("KERNEL_OK")
</pallas_src>

<mosaic_0001>
module attributes {stable_mosaic.version = 11 : i64} {
  func.func @_trim_kernel(%arg0: i32, %arg1: memref<8x32x32xf32, #tpu.memory_space<vmem>>, %arg2: memref<8x28x28xf32, #tpu.memory_space<vmem>>) attributes {dimension_semantics = [#tpu.dimension_semantics<parallel>], iteration_bounds = array<i64: 1>, scalar_prefetch = 0 : i64, scratch_operands = 0 : i64, tpu.core_type = #tpu.core_type<tc>, window_params = [{transform_indices = @transform_0, window_bounds = array<i64: 8, 32, 32>}, {transform_indices = @transform_1, window_bounds = array<i64: 8, 28, 28>}]} {
    %c0 = arith.constant 0 : index
    %c0_0 = arith.constant 0 : index
    %c0_1 = arith.constant 0 : index
    %0 = vector.load %arg1[%c0, %c0_0, %c0_1] : memref<8x32x32xf32, #tpu.memory_space<vmem>>, vector<8x28x28xf32>
    %c0_2 = arith.constant 0 : index
    %c0_3 = arith.constant 0 : index
    %c0_4 = arith.constant 0 : index
    %1 = vector.load %arg2[%c0_2, %c0_3, %c0_4] : memref<8x28x28xf32, #tpu.memory_space<vmem>>, vector<8x28x28xf32>
    tpu.vector_store %arg2[%c0_2, %c0_3, %c0_4], %0 {strides = array<i32>} : memref<8x28x28xf32, #tpu.memory_space<vmem>>, vector<8x28x28xf32>,
    return
  }
  func.func @transform_0(%arg0: i32) -> (i32, i32, i32) {
    %c0_i32 = arith.constant 0 : i32
    %c0_i32_0 = arith.constant 0 : i32
    %c0_i32_1 = arith.constant 0 : i32
    return %arg0, %c0_i32, %c0_i32_0 : i32, i32, i32
  }
  func.func @transform_1(%arg0: i32) -> (i32, i32, i32) {
    %c0_i32 = arith.constant 0 : i32
    %c0_i32_0 = arith.constant 0 : i32
    %c0_i32_1 = arith.constant 0 : i32
    return %arg0, %c0_i32, %c0_i32_0 : i32, i32, i32
  }
}

</mosaic_0001>

<bundles_post_ra>
// kernel: tpu_custom_call.1
= control target key start
LH: loop header
LB: loop body
LE: loop exit
PB: predicated region body
PF: predicated region fallthrough
CT: control target
= control target key end

     0   :  { %6 = vsyncpa [#allocation3], 0  ;;  %s120_s6 = smov [#allocation2]   ;;  %s273_s0 = inlined_call_operand.hbm [shape: f32[8,32,32], index: 0, kind: input, shape index: {}]   ;;  %s274_s1 = inlined_call_operand.vmem [shape: f32[8,28,28], index: 1, kind: output, shape index: {}]  }
   0x1   :  { %s12_s7 = sshll.u32 %s120_s6, 4  ;;  %s96_s10 = scalar_lea.hbm %s273_s0, 4096  ;;  %s13_s7 = int_to_ptr.vmem [resolvable:$true] %s12_s7 }
   0x2   :  { %p97_p0 = scmp.ne.s32.totalorder %s273_s0, %s96_s10  ;;  %p100_p1 = scmp.lt.u32.totalorder %s96_s10, %s273_s0 }
   0x4   :  { %p102_p2 = pnand %p100_p1, %p97_p0 }
   0x6   :  { %105 = shalt.err (!%p102_p2)
}
   0x7   :  { %s106_s15 = scalar_lea.vmem %s13_s7, 4096  ;;  %p111_p4 = scmp.lt.s32.totalorder %s13_s7, %s13_s7 }
   0x8   :  { %p107_p3 = scmp.ne.s32.totalorder %s13_s7, %s106_s15  ;;  %p112_p5 = scmp.lt.s32.totalorder %s106_s15, %s106_s15 }
   0xa   :  { %p113_p6 = por %p112_p5, %p111_p4 }
   0xc   :  { %p114_p7 = pnand %p113_p6, %p107_p3 }
   0xe   :  { %117 = shalt.err (!%p114_p7)
}
   0xf   :  { %s121_s16 = smov 128   ;;  %s122_s17 = smov 8  }
  0x10   :  { %18 = dma.hbm_to_vmem [thread:$0]  %s273_s0, 4096, %s13_s7, [#allocation3], %s121_s16, %s121_s16, %s122_s17  }
  0x11   :  { %118 = dma.done.wait [#allocation3], 4096  }
  0x12   :  { %119 = vsyncadd [#allocation3], 4294963200  ;;  %vm54_vm0 = vcmask 228352   ;;  %vm58_vm1 = vcmask 224256   ;;  %v22_v0 = vld [vmem:[#allocation2] sm:$0xff]  ;;  %v23_v1 = vld [vmem:[#allocation2 + $0x8] sm:$0xff] }
  0x13   :  { %v24_v2 = vld [vmem:[#allocation2 + $0x10] sm:$0xff]  ;;  %55 = vst.msk [vmem:[%s274_s1] sm:$0xff] %vm54_vm0, %v22_v0  ;;  %56 = vst.msk [vmem:[%s274_s1 + $0x8] sm:$0xff] %vm54_vm0, %v23_v1  ;;  %v25_v3 = vld [vmem:[#allocation2 + $0x18] sm:$0xf] }
  0x14   :  { %57 = vst.msk [vmem:[%s274_s1 + $0x10] sm:$0xff] %vm54_vm0, %v24_v2  ;;  %v26_v4 = vld [vmem:[#allocation2 + $0x20] sm:$0xff]  ;;  %v27_v5 = vld [vmem:[#allocation2 + $0x28] sm:$0xff]  ;;  %v28_v6 = vld [vmem:[#allocation2 + $0x30] sm:$0xff] }
  0x15   :  { %59 = vst.msk [vmem:[%s274_s1 + $0x18] sm:$0xf] %vm58_vm1, %v25_v3  ;;  %v29_v7 = vld [vmem:[#allocation2 + $0x38] sm:$0xf]  ;;  %v30_v8 = vld [vmem:[#allocation2 + $0x40] sm:$0xff]  ;;  %v31_v9 = vld [vmem:[#allocation2 + $0x48] sm:$0xff] }
  0x16   :  { %60 = vst.msk [vmem:[%s274_s1 + $0x20] sm:$0xff] %vm54_vm0, %v26_v4  ;;  %61 = vst.msk [vmem:[%s274_s1 + $0x28] sm:$0xff] %vm54_vm0, %v27_v5  ;;  %v32_v10 = vld [vmem:[#allocation2 + $0x50] sm:$0xff]  ;;  %v33_v11 = vld [vmem:[#allocation2 + $0x58] sm:$0xf] }
  0x17   :  { %62 = vst.msk [vmem:[%s274_s1 + $0x30] sm:$0xff] %vm54_vm0, %v28_v6  ;;  %64 = vst.msk [vmem:[%s274_s1 + $0x40] sm:$0xff] %vm54_vm0, %v30_v8  ;;  %v34_v12 = vld [vmem:[#allocation2 + $0x60] sm:$0xff]  ;;  %v35_v13 = vld [vmem:[#allocation2 + $0x68] sm:$0xff] }
  0x18   :  { %63 = vst.msk [vmem:[%s274_s1 + $0x38] sm:$0xf] %vm58_vm1, %v29_v7  ;;  %67 = vst.msk [vmem:[%s274_s1 + $0x58] sm:$0xf] %vm58_vm1, %v33_v11  ;;  %v36_v14 = vld [vmem:[#allocation2 + $0x70] sm:$0xff]  ;;  %v38_v16 = vld [vmem:[#allocation2 + $0x80] sm:$0xff] }
  0x19   :  { %65 = vst.msk [vmem:[%s274_s1 + $0x48] sm:$0xff] %vm54_vm0, %v31_v9  ;;  %66 = vst.msk [vmem:[%s274_s1 + $0x50] sm:$0xff] %vm54_vm0, %v32_v10  ;;  %v37_v15 = vld [vmem:[#allocation2 + $0x78] sm:$0xf]  ;;  %v39_v17 = vld [vmem:[#allocation2 + $0x88] sm:$0xff] }
  0x1a   :  { %68 = vst.msk [vmem:[%s274_s1 + $0x60] sm:$0xff] %vm54_vm0, %v34_v12  ;;  %69 = vst.msk [vmem:[%s274_s1 + $0x68] sm:$0xff] %vm54_vm0, %v35_v13  ;;  %v40_v18 = vld [vmem:[#allocation2 + $0x90] sm:$0xff]  ;;  %v41_v19 = vld [vmem:[#allocation2 + $0x98] sm:$0xf] }
  0x1b   :  { %70 = vst.msk [vmem:[%s274_s1 + $0x70] sm:$0xff] %vm54_vm0, %v36_v14  ;;  %72 = vst.msk [vmem:[%s274_s1 + $0x80] sm:$0xff] %vm54_vm0, %v38_v16  ;;  %v42_v20 = vld [vmem:[#allocation2 + $0xa0] sm:$0xff]  ;;  %v43_v21 = vld [vmem:[#allocation2 + $0xa8] sm:$0xff] }
  0x1c   :  { %71 = vst.msk [vmem:[%s274_s1 + $0x78] sm:$0xf] %vm58_vm1, %v37_v15  ;;  %75 = vst.msk [vmem:[%s274_s1 + $0x98] sm:$0xf] %vm58_vm1, %v41_v19  ;;  %v44_v22 = vld [vmem:[#allocation2 + $0xb0] sm:$0xff]  ;;  %v46_v24 = vld [vmem:[#allocation2 + $0xc0] sm:$0xff] }
  0x1d   :  { %73 = vst.msk [vmem:[%s274_s1 + $0x88] sm:$0xff] %vm54_vm0, %v39_v17  ;;  %74 = vst.msk [vmem:[%s274_s1 + $0x90] sm:$0xff] %vm54_vm0, %v40_v18  ;;  %v45_v23 = vld [vmem:[#allocation2 + $0xb8] sm:$0xf]  ;;  %v47_v25 = vld [vmem:[#allocation2 + $0xc8] sm:$0xff] }
  0x1e   :  { %76 = vst.msk [vmem:[%s274_s1 + $0xa0] sm:$0xff] %vm54_vm0, %v42_v20  ;;  %77 = vst.msk [vmem:[%s274_s1 + $0xa8] sm:$0xff] %vm54_vm0, %v43_v21  ;;  %v48_v26 = vld [vmem:[#allocation2 + $0xd0] sm:$0xff]  ;;  %v49_v27 = vld [vmem:[#allocation2 + $0xd8] sm:$0xf] }
  0x1f   :  { %78 = vst.msk [vmem:[%s274_s1 + $0xb0] sm:$0xff] %vm54_vm0, %v44_v22  ;;  %80 = vst.msk [vmem:[%s274_s1 + $0xc0] sm:$0xff] %vm54_vm0, %v46_v24  ;;  %v50_v28 = vld [vmem:[#allocation2 + $0xe0] sm:$0xff]  ;;  %v51_v29 = vld [vmem:[#allocation2 + $0xe8] sm:$0xff] }
  0x20   :  { %79 = vst.msk [vmem:[%s274_s1 + $0xb8] sm:$0xf] %vm58_vm1, %v45_v23  ;;  %83 = vst.msk [vmem:[%s274_s1 + $0xd8] sm:$0xf] %vm58_vm1, %v49_v27  ;;  %v52_v30 = vld [vmem:[#allocation2 + $0xf0] sm:$0xff] }
  0x21   :  { %81 = vst.msk [vmem:[%s274_s1 + $0xc8] sm:$0xff] %vm54_vm0, %v47_v25  ;;  %82 = vst.msk [vmem:[%s274_s1 + $0xd0] sm:$0xff] %vm54_vm0, %v48_v26  ;;  %v53_v31 = vld [vmem:[#allocation2 + $0xf8] sm:$0xf] }
  0x22   :  { %84 = vst.msk [vmem:[%s274_s1 + $0xe0] sm:$0xff] %vm54_vm0, %v50_v28  ;;  %85 = vst.msk [vmem:[%s274_s1 + $0xe8] sm:$0xff] %vm54_vm0, %v51_v29 }
  0x23   :  { %86 = vst.msk [vmem:[%s274_s1 + $0xf0] sm:$0xff] %vm54_vm0, %v52_v30 }
  0x24   :  { %87 = vst.msk [vmem:[%s274_s1 + $0xf8] sm:$0xf] %vm58_vm1, %v53_v31 }
  0x25   :  { %92 = vsyncpa [#allocation3], 1 }

</bundles_post_ra>
